<compile_context>
chip_gen: v7x
topology: tpu7x:2x2x1
jax: 0.10.0
libtpu: 0.0.40
codegen_flags: <defaults>
</compile_context>

<pallas_src>
import functools

import jax
import jax.numpy as jnp
from jax.experimental import pallas as pl
from jax.experimental.pallas import tpu as pltpu

_LANE = 128


def _mish_kernel(x_ref, o_ref, *, refine_reciprocal: bool):
    # Upcast so 16-bit inputs get f32-accurate transcendentals (no-op for f32).
    x = x_ref[...].astype(jnp.float32)
    # Single-exp rational form: tanh(softplus(x)) = e^x(e^x+2) / (e^x(e^x+2)+2)
    t = jnp.exp(x)
    num = t * (t + 2.0)
    den = num + 2.0
    # EUP approx reciprocal instead of an exact f32 divide; one Newton-Raphson
    # step (pure VALU work, idle in this mem-bound kernel) restores f32 accuracy.
    r = pl.reciprocal(den, approx=True)
    if refine_reciprocal:
        r = r * (2.0 - den * r)
    y = x * num * r
    # For x > 20, tanh(softplus(x)) == 1 to f32 precision (mirrors PyTorch's
    # softplus threshold); the select also discards inf/nan lanes produced when
    # exp(x) overflows inside the rational form.
    o_ref[...] = jnp.where(x > 20.0, x, y).astype(o_ref.dtype)


def _mish_xla(x):
    # Plain-XLA fallback for the <128-element lane remainder.
    xf = x.astype(jnp.float32)
    return (xf * jnp.tanh(jnp.logaddexp(xf, 0.0))).astype(x.dtype)


def _chip_tuning():
    """(target block bytes, min grid steps) per TPU generation."""
    try:
        kind = jax.devices()[0].device_kind.lower()
    except Exception:
        kind = ""
    if "v7" in kind:
        # ~3.2 TB/s HBM, 64 MiB VMEM, 2 TensorCores -> big blocks, >= 8 steps.
        return 6 * 1024 * 1024, 8
    if "v6" in kind:
        return 4 * 1024 * 1024, 4
    # v5e / unknown: 16 MiB scoped-VMEM default -> 2 MiB blocks (4x block fits).
    return 2 * 1024 * 1024, 4


def _mish_bulk_2d(x2d, *, block_rows, refine):
    rows, width = x2d.shape
    dtype = x2d.dtype
    elem_bytes = jnp.dtype(dtype).itemsize
    n = rows * width
    block_bytes = block_rows * width * elem_bytes
    return pl.pallas_call(
        functools.partial(_mish_kernel, refine_reciprocal=refine),
        out_shape=jax.ShapeDtypeStruct((rows, width), dtype),
        grid_spec=pltpu.PrefetchScalarGridSpec(
            num_scalar_prefetch=0,
            grid=(pl.cdiv(rows, block_rows),),
            in_specs=[pl.BlockSpec((block_rows, width), lambda i: (i, 0))],
            out_specs=pl.BlockSpec((block_rows, width), lambda i: (i, 0)),
        ),
        compiler_params=pltpu.CompilerParams(
            dimension_semantics=("parallel",),
            # Double-buffered in + out = 4x block; leave explicit headroom.
            vmem_limit_bytes=4 * block_bytes + (4 << 20),
            allow_input_fusion=[True],
        ),
        cost_estimate=pl.CostEstimate(
            flops=8 * n,
            transcendentals=2 * n,
            bytes_accessed=2 * n * elem_bytes,
        ),
    )(x2d)


def mish_pallas(x: jax.Array, *, target_block_bytes: int | None = None) -> jax.Array:
    """Elementwise Mish via a Pallas TPU kernel. Accepts any shape/float dtype."""
    orig_shape = x.shape
    dtype = x.dtype
    n = x.size
    if n == 0:
        return x

    default_block_bytes, min_steps = _chip_tuning()
    if target_block_bytes is None:
        target_block_bytes = default_block_bytes

    x_flat = x.reshape(-1)

    # 128-aligned bulk goes through the Pallas kernel; the (<128-element) lane
    # remainder is handled in plain XLA so we never pay a full-array pad copy.
    n_bulk = (n // _LANE) * _LANE
    pieces = []

    if n_bulk:
        bulk = x_flat if n_bulk == n else x_flat[:n_bulk]
        n128 = n_bulk // _LANE

        # Lane-dense slab width: largest multiple of 128 (<= 4096) dividing the
        # bulk length, so the 2D reshape needs no padding at all.
        width = _LANE
        for d in (32, 16, 8, 4, 2):
            if n128 % d == 0:
                width = _LANE * d
                break
        rows = n_bulk // width
        x2d = bulk.reshape(rows, width)

        elem_bytes = jnp.dtype(dtype).itemsize
        total_bytes = n_bulk * elem_bytes
        target_rows = max(1, target_block_bytes // (width * elem_bytes))

        if rows < 16:
            # Tiny tensor: single full-array block (allowed by the tiling rule).
            block_rows = rows
        else:
            # Guarantee >= min_steps grid steps once the tensor is big enough to
            # benefit from pipelining (and, on v7x, from both TensorCores).
            steps_cap = pl.cdiv(rows, min_steps) if total_bytes >= (1 << 20) else rows
            block_rows = min(target_rows, steps_cap)
            # Multiple of 16 keeps the block valid for both f32 (8,128) and
            # bf16/f16 (16,128) sublane tiling; ragged last block is masked.
            block_rows = max(16, (block_rows // 16) * 16)
            block_rows = min(block_rows, rows)

        refine = jnp.dtype(dtype).itemsize >= 4  # NR step only needed for f32
        out_bulk = _mish_bulk_2d(x2d, block_rows=block_rows, refine=refine)
        pieces.append(out_bulk.reshape(-1))

    if n_bulk != n:
        pieces.append(_mish_xla(x_flat[n_bulk:]))

    out_flat = pieces[0] if len(pieces) == 1 else jnp.concatenate(pieces)
    return out_flat.reshape(orig_shape)


def _mish_ref(x):
    # Reference: x * tanh(softplus(x)) with stable softplus = logaddexp(x, 0).
    return x * jnp.tanh(jnp.logaddexp(x, 0.0))


if __name__ == "__main__":
    key = jax.random.PRNGKey(0)
    # Small NCHW-like activation tensor consistent with the module's usage.
    x = jax.random.normal(key, (2, 4, 16, 16), dtype=jnp.float32) * 3.0

    y = mish_pallas(x)
    jax.block_until_ready(y)

    y_ref = _mish_ref(x)
    assert y.shape == x.shape and y.dtype == x.dtype
    assert jnp.allclose(y, y_ref, atol=1e-5, rtol=1e-5)
    print("KERNEL_OK")
</pallas_src>

<mosaic_0001>
module attributes {stable_mosaic.version = 11 : i64} {
  func.func @_mish_kernel(%arg0: i32, %arg1: memref<1x2048xf32, #tpu.memory_space<vmem>>, %arg2: memref<1x2048xf32, #tpu.memory_space<vmem>>) attributes {dimension_semantics = [#tpu.dimension_semantics<parallel>], iteration_bounds = array<i64: 1>, scalar_prefetch = 0 : i64, scratch_operands = 0 : i64, tpu.core_type = #tpu.core_type<tc>, window_params = [{transform_indices = @transform_0, window_bounds = array<i64: 1, 2048>}, {transform_indices = @transform_1, window_bounds = array<i64: 1, 2048>}]} {
    %c0 = arith.constant 0 : index
    %c0_0 = arith.constant 0 : index
    %0 = vector.load %arg1[%c0, %c0_0] : memref<1x2048xf32, #tpu.memory_space<vmem>>, vector<1x2048xf32>
    %1 = math.exp %0 : vector<1x2048xf32>
    %cst = arith.constant 2.000000e+00 : f32
    %2 = vector.broadcast %cst : f32 to vector<1x2048xf32>
    %3 = arith.addf %1, %2 : vector<1x2048xf32>
    %4 = arith.mulf %1, %3 : vector<1x2048xf32>
    %cst_1 = arith.constant 2.000000e+00 : f32
    %5 = vector.broadcast %cst_1 : f32 to vector<1x2048xf32>
    %6 = arith.addf %4, %5 : vector<1x2048xf32>
    %7 = tpu.reciprocal %6 {approx = true} : vector<1x2048xf32> -> vector<1x2048xf32>
    %8 = arith.mulf %6, %7 : vector<1x2048xf32>
    %cst_2 = arith.constant 2.000000e+00 : f32
    %9 = vector.broadcast %cst_2 : f32 to vector<1x2048xf32>
    %10 = arith.subf %9, %8 : vector<1x2048xf32>
    %11 = arith.mulf %7, %10 : vector<1x2048xf32>
    %12 = arith.mulf %0, %4 : vector<1x2048xf32>
    %13 = arith.mulf %12, %11 : vector<1x2048xf32>
    %cst_3 = arith.constant 2.000000e+01 : f32
    %14 = vector.broadcast %cst_3 : f32 to vector<1x2048xf32>
    %15 = arith.cmpf ogt, %0, %14 : vector<1x2048xf32>
    %16 = arith.select %15, %0, %13 : vector<1x2048xi1>, vector<1x2048xf32>
    %c0_4 = arith.constant 0 : index
    %c0_5 = arith.constant 0 : index
    %17 = vector.load %arg2[%c0_4, %c0_5] : memref<1x2048xf32, #tpu.memory_space<vmem>>, vector<1x2048xf32>
    tpu.vector_store %arg2[%c0_4, %c0_5], %16 {strides = array<i32>} : memref<1x2048xf32, #tpu.memory_space<vmem>>, vector<1x2048xf32>,
    return
  }
  func.func @transform_0(%arg0: i32) -> (i32, i32) {
    %c0_i32 = arith.constant 0 : i32
    %c0_i32_0 = arith.constant 0 : i32
    return %arg0, %c0_i32 : i32, i32
  }
  func.func @transform_1(%arg0: i32) -> (i32, i32) {
    %c0_i32 = arith.constant 0 : i32
    %c0_i32_0 = arith.constant 0 : i32
    return %arg0, %c0_i32 : i32, i32
  }
}

</mosaic_0001>

<bundles_post_ra>
// kernel: tpu_custom_call.1
= control target key start
LH: loop header
LB: loop body
LE: loop exit
PB: predicated region body
PF: predicated region fallthrough
CT: control target
= control target key end

     0   :  { %6 = vsyncpa [#allocation3], 0  ;;  %s160_s0 = inlined_call_operand.hbm [shape: f32[1,2048], index: 0, kind: input, shape index: {}]   ;;  %s161_s1 = inlined_call_operand.hbm [shape: f32[1,2048], index: 1, kind: output, shape index: {}]  }
   0x1   :  { %7 = vsyncpa [#allocation4], 0  ;;  %s124_s6 = smov [#allocation2]   ;;  %s76_s10 = scalar_lea.hbm %s160_s0, 256 }
   0x2   :  { %s14_s7 = sshll.u32 %s124_s6, 4  ;;  %p77_p0 = scmp.ne.s32.totalorder %s160_s0, %s76_s10  ;;  %s15_s7 = int_to_ptr.vmem [resolvable:$true] %s14_s7 }
   0x3   :  { %p80_p1 = scmp.lt.u32.totalorder %s76_s10, %s160_s0 }
   0x5   :  { %p82_p2 = pnand %p80_p1, %p77_p0 }
   0x7   :  { %85 = shalt.err (!%p82_p2)
}
   0x8   :  { %s86_s15 = scalar_lea.vmem %s15_s7, 256  ;;  %p91_p4 = scmp.lt.s32.totalorder %s15_s7, %s15_s7 }
   0x9   :  { %p87_p3 = scmp.ne.s32.totalorder %s15_s7, %s86_s15  ;;  %p92_p5 = scmp.lt.s32.totalorder %s86_s15, %s86_s15 }
   0xb   :  { %p93_p6 = por %p92_p5, %p91_p4 }
   0xd   :  { %p94_p7 = pnand %p93_p6, %p87_p3 }
   0xf   :  { %97 = shalt.err (!%p94_p7)
}
  0x10   :  { %17 = dma.hbm_to_vmem [thread:$0]  %s160_s0, 256, %s15_s7, [#allocation3]  }
  0x11   :  { %120 = dma.done.wait [#allocation3], 256  }
  0x12   :  { %121 = vsyncadd [#allocation3], 4294967040  ;;  %v21_v0 = vld [vmem:[#allocation2] sm:$0xff]  ;;  %v22_v1 = vld [vmem:[#allocation2 + $0x8] sm:$0xff]  ;;  %s125_s0 = smov [#allocation5]  }
  0x13   :  { %v23_v2 = vmul.f32 1.442695, %v21_v0  ;;  %v25_v3 = vmul.f32 1.442695, %v22_v1  ;;  %vm45_vm0 = vcmp.gt.f32.partialorder %v21_v0, 20.0  ;;  %s57_s18 = sshll.u32 %s125_s0, 4  ;;  %s58_s18 = int_to_ptr.vmem [resolvable:$true] %s57_s18 }
  0x14   :  { %vm46_vm1 = vcmp.gt.f32.partialorder %v22_v1, 20.0  ;;  %s98_s19 = scalar_lea.vmem %s58_s18, 256  ;;  %p103_p9 = scmp.lt.s32.totalorder %s58_s18, %s58_s18 }
  0x15   :  { %68 = vpow2.f32 %v23_v2  ;;  %p99_p8 = scmp.ne.s32.totalorder %s58_s18, %s98_s19  ;;  %p104_p10 = scmp.lt.s32.totalorder %s98_s19, %s98_s19 }
  0x16   :  { %70 = vpow2.f32 %v25_v3 }
  0x17   :  { %p105_p11 = por %p104_p10, %p103_p9 }
  0x19   :  { %p106_p12 = pnand %p105_p11, %p99_p8 }
  0x1f   :  { %v69_v4 = vpop.eup %68 }
  0x20   :  { %v71_v5 = vpop.eup %70  ;;  %v27_v6 = vadd.f32 2.0, %v69_v4 }
  0x21   :  { %v28_v7 = vadd.f32 2.0, %v71_v5 }
  0x22   :  { %v29_v8 = vmul.f32 %v69_v4, %v27_v6 }
  0x23   :  { %v30_v9 = vmul.f32 %v71_v5, %v28_v7 }
  0x24   :  { %v31_v10 = vadd.f32 2.0, %v29_v8  ;;  %v41_v17 = vmul.f32 %v29_v8, %v21_v0 }
  0x25   :  { %v32_v11 = vadd.f32 2.0, %v30_v9  ;;  %v42_v19 = vmul.f32 %v30_v9, %v22_v1 }
  0x26   :  { %72 = vrcp.f32 %v31_v10 }
  0x27   :  { %74 = vrcp.f32 %v32_v11 }
  0x30   :  { %v73_v12 = vpop.eup %72 }
  0x31   :  { %v75_v13 = vpop.eup %74  ;;  %v35_v14 = vmul.f32 %v73_v12, %v31_v10 }
  0x32   :  { %v36_v15 = vmul.f32 %v75_v13, %v32_v11 }
  0x33   :  { %v37_v16 = vsub.f32 2.0, %v35_v14 }
  0x34   :  { %v38_v18 = vsub.f32 2.0, %v36_v15 }
  0x35   :  { %v39_v20 = vmul.f32 %v73_v12, %v37_v16 }
  0x36   :  { %v40_v21 = vmul.f32 %v75_v13, %v38_v18 }
  0x37   :  { %v43_v22 = vmul.f32 %v41_v17, %v39_v20 }
  0x38   :  { %v44_v23 = vmul.f32 %v42_v19, %v40_v21 }
  0x39   :  { %v47_v24 = vsel %vm45_vm0, %v21_v0, %v43_v22 }
  0x3a   :  { %49 = vst [vmem:[#allocation5] sm:$0xff] %v47_v24  ;;  %v48_v25 = vsel %vm46_vm1, %v22_v1, %v44_v23 }
  0x3b   :  { %50 = vst [vmem:[#allocation5 + $0x8] sm:$0xff] %v48_v25 }
  0x3c   :  { %109 = shalt.err (!%p106_p12)
}
  0x3d   :  { %s110_s22 = scalar_lea.hbm %s161_s1, 256 }
  0x3e   :  { %p111_p13 = scmp.ne.s32.totalorder %s161_s1, %s110_s22  ;;  %p114_p0 = scmp.lt.u32.totalorder %s110_s22, %s161_s1 }
  0x40   :  { %p116_p1 = pnand %p114_p0, %p111_p13 }
  0x42   :  { %119 = shalt.err (!%p116_p1)
}
  0x43   :  { %60 = dma.vmem_to_hbm [thread:$0]  %s58_s18, 256, %s161_s1, [#allocation4]  }
  0x44   :  { %122 = dma.done.wait [#allocation4], 256  }
  0x45   :  { %123 = vsyncadd [#allocation4], 4294967040 }
  0x46   :  { %64 = vsyncpa [#allocation3], 1 }
  0x47   :  { %65 = vsyncpa [#allocation4], 1 }

</bundles_post_ra>
